<compile_context>
chip_gen: v7x
topology: tpu7x:2x2x1
jax: 0.10.0
libtpu: 0.0.40
codegen_flags: <defaults>
</compile_context>

<pallas_src>
import functools

import jax
import jax.numpy as jnp
from jax.experimental import pallas as pl
from jax.experimental.pallas import tpu as pltpu


def _round_up(x, m):
    return (x + m - 1) // m * m


def _vmem_budget_bytes():
    """~80% of this chip's physical VMEM; conservative 64 MiB fallback (v7x-safe)."""
    try:
        cap = int(pltpu.get_tpu_info().vmem_capacity_bytes)
    except Exception:
        cap = 64 << 20
    return max(16 << 20, int(cap * 0.8))


def mlp_kernel(x_ref, w_in_ref, b_in_ref, w_h_ref, b_h_ref, w_out_ref, b_out_ref,
               o_ref, *, n_layer):
    tile_b = x_ref.shape[0]
    h_pad = w_h_ref.shape[1]

    # Hoist all ref loads and the hidden-bias broadcast out of the unrolled layer loop.
    # (JAX does not CSE broadcast_in_dim; with unroll=True it would be re-emitted
    # n_layer times otherwise.)
    x = x_ref[...]              # bf16 [tile_b, F_pad]
    w_in = w_in_ref[...]        # bf16 [F_pad, H_pad]
    w_h = w_h_ref[...]          # bf16 [H_pad, H_pad]
    w_out = w_out_ref[...]      # bf16 [H_pad, O_pad]
    b_in = b_in_ref[...]        # f32  [1, H_pad]
    b_out = b_out_ref[...]      # f32  [1, O_pad]
    b_h_b = jnp.broadcast_to(b_h_ref[...], (tile_b, h_pad))  # f32 [tile_b, H_pad]

    # Input layer + ReLU: bf16 MXU matmul, f32 accumulate, bias add + ReLU in f32,
    # then carry the activation in bf16 (halves live-activation footprint).
    h = jnp.dot(x, w_in, preferred_element_type=jnp.float32)
    h = jnp.maximum(h + b_in, 0.0).astype(jnp.bfloat16)

    # n_layer applications of the shared hidden layer + ReLU, fully unrolled (static count).
    def body(_, h):
        y = jnp.dot(h, w_h, preferred_element_type=jnp.float32)
        return jnp.maximum(y + b_h_b, 0.0).astype(jnp.bfloat16)

    h = jax.lax.fori_loop(0, n_layer, body, h, unroll=True)

    # Output layer (no activation). Full 128-lane-wide f32 store.
    y = jnp.dot(h, w_out, preferred_element_type=jnp.float32)
    o_ref[...] = y + b_out


def init_params(key, n_feature, n_hidden, n_output):
    """Deterministic synthetic parameter init (PyTorch-Linear-like uniform bounds)."""
    ks = jax.random.split(key, 6)

    def lin(kw, kb, fan_in, fan_out):
        bound = 1.0 / jnp.sqrt(fan_in)
        # Stored as [in, out] so the kernel computes x @ W (== PyTorch x @ W^T + b).
        w = jax.random.uniform(kw, (fan_in, fan_out), jnp.float32, -bound, bound)
        b = jax.random.uniform(kb, (1, fan_out), jnp.float32, -bound, bound)
        return w, b

    w_in, b_in = lin(ks[0], ks[1], n_feature, n_hidden)
    w_h, b_h = lin(ks[2], ks[3], n_hidden, n_hidden)
    w_out, b_out = lin(ks[4], ks[5], n_hidden, n_output)
    return dict(w_in=w_in, b_in=b_in, w_h=w_h, b_h=b_h, w_out=w_out, b_out=b_out)


def prepare_params(params, param_dtype=jnp.bfloat16):
    """Pad (lane dims -> multiples of 128) and cast the weights ONCE, outside the
    per-call forward path, so every call avoids the weight-read/rewrite HBM round trip."""
    F, H = params["w_in"].shape
    O = params["w_out"].shape[1]
    F_pad = _round_up(max(F, 1), 128)
    H_pad = _round_up(max(H, 1), 128)
    O_pad = _round_up(max(O, 1), 128)

    def pad2(a, rows, cols, dtype):
        out = jnp.zeros((rows, cols), dtype)
        return out.at[: a.shape[0], : a.shape[1]].set(a.astype(dtype))

    # Zero padding keeps semantics exact: padded input columns, weight rows/cols and bias
    # entries are zero, ReLU(0)=0, so padded lanes stay zero through every layer.
    return dict(
        w_in=pad2(params["w_in"], F_pad, H_pad, param_dtype),
        w_h=pad2(params["w_h"], H_pad, H_pad, param_dtype),
        w_out=pad2(params["w_out"], H_pad, O_pad, param_dtype),
        b_in=pad2(params["b_in"], 1, H_pad, jnp.float32),
        b_h=pad2(params["b_h"], 1, H_pad, jnp.float32),
        b_out=pad2(params["b_out"], 1, O_pad, jnp.float32),
        dims=(F, H, O),
        param_dtype=param_dtype,
    )


def _build_call(grid, tile_b, F_pad, H_pad, O_pad, B_pad, n_layer, vmem_limit,
                single_buffer_weights):
    def resident(shape):
        # Constant index_map across the grid; single-buffer to avoid paying 2x VMEM for
        # the resident weights/biases (critical on v7x's 64 MiB VMEM).
        if single_buffer_weights:
            return pl.BlockSpec(shape, lambda i: (0, 0), pipeline_mode=pl.Buffered(1))
        return pl.BlockSpec(shape, lambda i: (0, 0))

    kernel = functools.partial(mlp_kernel, n_layer=int(n_layer))
    return pl.pallas_call(
        kernel,
        out_shape=jax.ShapeDtypeStruct((B_pad, O_pad), jnp.float32),
        grid_spec=pltpu.PrefetchScalarGridSpec(
            num_scalar_prefetch=0,
            grid=grid,
            in_specs=[
                pl.BlockSpec((tile_b, F_pad), lambda i: (i, 0)),  # x tile (batch, 2-buffered)
                resident((F_pad, H_pad)),                         # w_in
                resident((1, H_pad)),                             # b_in
                resident((H_pad, H_pad)),                         # w_h
                resident((1, H_pad)),                             # b_h
                resident((H_pad, O_pad)),                         # w_out
                resident((1, O_pad)),                             # b_out
            ],
            out_specs=pl.BlockSpec((tile_b, O_pad), lambda i: (i, 0)),
        ),
        compiler_params=pltpu.CompilerParams(
            dimension_semantics=("parallel",),
            vmem_limit_bytes=vmem_limit,
        ),
    )


def net_forward(x, prepared, n_layer, *, tile_b=None):
    """MLP forward pass as a single fused Pallas kernel.

    x: [B, n_feature] float32
    prepared: output of prepare_params() (padded bf16 weights, f32 biases).
    """
    B, F = x.shape
    F_orig, _H_orig, O_orig = prepared["dims"]
    assert F == F_orig, "x feature dim does not match prepared params"
    param_dtype = prepared["param_dtype"]

    w_in, w_h, w_out = prepared["w_in"], prepared["w_h"], prepared["w_out"]
    b_in, b_h, b_out = prepared["b_in"], prepared["b_h"], prepared["b_out"]
    F_pad, H_pad = w_in.shape
    O_pad = w_out.shape[1]

    vmem_budget = _vmem_budget_bytes()
    # bf16 native tile is (16, 128): round batch padding / tiles to multiples of 16.
    B16 = _round_up(max(B, 1), 16)
    max_tile = 1024 if vmem_budget >= (96 << 20) else 512  # v5e/v6e vs v7x-sized VMEM
    if tile_b is None:
        if B16 > 16:
            # >= 2 grid steps: pipelines x/out DMAs and lets v7x's 2 TCs split the batch.
            tile_b = min(max_tile, _round_up(pl.cdiv(B16, 2), 16))
        else:
            tile_b = B16
    else:
        if tile_b <= 0 or tile_b % 16 != 0:
            raise ValueError("tile_b must be a positive multiple of 16 (bf16 sublane packing)")
    B_pad = _round_up(B16, tile_b)
    grid = (B_pad // tile_b,)

    # Only the activations are padded per call; weights were prepared once.
    x_p = jnp.zeros((B_pad, F_pad), param_dtype).at[:B, :F].set(x.astype(param_dtype))

    # VMEM budget: x/out double-buffered, weights/biases single-buffered, plus live
    # activations (bf16 carry + f32 matmul result + broadcast bias) and headroom.
    wbytes = jnp.dtype(param_dtype).itemsize
    vmem_est = (
        2 * tile_b * F_pad * wbytes
        + 2 * tile_b * O_pad * 4
        + (F_pad * H_pad + H_pad * H_pad + H_pad * O_pad) * wbytes
        + (2 * H_pad + O_pad) * 4
        + 3 * tile_b * H_pad * 4
    )
    vmem_limit = int(min(vmem_budget, max(2 * vmem_est, 16 << 20)))
    # TODO(synk): for H_pad >~ 4k on v7x (64 MiB VMEM), add a K/N-tiled w_h path with an
    # f32 accumulator scratch instead of relying on the resident-weight fast path.

    args = (x_p, w_in, b_in, w_h, b_h, w_out, b_out)
    try:
        out_pad = _build_call(grid, tile_b, F_pad, H_pad, O_pad, B_pad, n_layer,
                              vmem_limit, single_buffer_weights=True)(*args)
    except Exception:
        # Fallback for Pallas versions that reject Buffered(1) single-buffering.
        out_pad = _build_call(grid, tile_b, F_pad, H_pad, O_pad, B_pad, n_layer,
                              vmem_limit, single_buffer_weights=False)(*args)

    return out_pad[:B, :O_orig]


def reference_forward(x, params, n_layer, dtype=jnp.float32):
    """Pure-JAX reference. dtype=jnp.bfloat16 emulates the kernel's MXU precision."""
    def mm(a, w):
        return jnp.dot(a.astype(dtype), w.astype(dtype),
                       preferred_element_type=jnp.float32)

    h = jnp.maximum(mm(x, params["w_in"]) + params["b_in"], 0.0)
    for _ in range(n_layer):
        h = jnp.maximum(mm(h, params["w_h"]) + params["b_h"], 0.0)
    return mm(h, params["w_out"]) + params["b_out"]


if __name__ == "__main__":
    # Small shapes consistent with the module's forward.
    batch, n_feature, n_hidden, n_output, n_layer = 8, 8, 32, 4, 3

    key = jax.random.PRNGKey(0)
    kx, kp, kx2, kp2 = jax.random.split(key, 4)

    x = jax.random.normal(kx, (batch, n_feature), dtype=jnp.float32)
    params = init_params(kp, n_feature, n_hidden, n_output)
    prepared = prepare_params(params)  # pad/cast the weights once, not per forward call

    out = jax.block_until_ready(net_forward(x, prepared, n_layer))
    assert out.shape == (batch, n_output)

    ref_bf16 = reference_forward(x, params, n_layer, dtype=jnp.bfloat16)
    ref_f32 = reference_forward(x, params, n_layer, dtype=jnp.float32)
    assert jnp.allclose(out, ref_bf16, atol=1e-2, rtol=1e-2)
    assert jnp.allclose(out, ref_f32, atol=1e-1, rtol=1e-1)

    # Second case: non-multiple batch + caller-supplied tile -> multi-step pipelined grid.
    B2, F2, H2, O2, L2 = 300, 8, 64, 3, 2
    x2 = jax.random.normal(kx2, (B2, F2), dtype=jnp.float32)
    p2 = init_params(kp2, F2, H2, O2)
    prep2 = prepare_params(p2)
    out2 = jax.block_until_ready(net_forward(x2, prep2, L2, tile_b=128))
    assert out2.shape == (B2, O2)
    ref2 = reference_forward(x2, p2, L2, dtype=jnp.bfloat16)
    assert jnp.allclose(out2, ref2, atol=1e-2, rtol=1e-2)

    # Third case: default tile_b heuristic (>=2 grid steps, megacore-friendly split).
    out3 = jax.block_until_ready(net_forward(x2, prep2, L2))
    assert out3.shape == (B2, O2)
    assert jnp.allclose(out3, ref2, atol=1e-2, rtol=1e-2)

    print("KERNEL_OK")
</pallas_src>

<mosaic_0001>
module attributes {stable_mosaic.version = 11 : i64} {
  func.func @mlp_kernel(%arg0: i32, %arg1: memref<16x128xbf16, #tpu.memory_space<vmem>>, %arg2: memref<128x128xbf16, #tpu.memory_space<vmem>>, %arg3: memref<1x128xf32, #tpu.memory_space<vmem>>, %arg4: memref<128x128xbf16, #tpu.memory_space<vmem>>, %arg5: memref<1x128xf32, #tpu.memory_space<vmem>>, %arg6: memref<128x128xbf16, #tpu.memory_space<vmem>>, %arg7: memref<1x128xf32, #tpu.memory_space<vmem>>, %arg8: memref<16x128xf32, #tpu.memory_space<vmem>>) attributes {dimension_semantics = [#tpu.dimension_semantics<parallel>], iteration_bounds = array<i64: 1>, scalar_prefetch = 0 : i64, scratch_operands = 0 : i64, tpu.core_type = #tpu.core_type<tc>, window_params = [{transform_indices = @transform_0, window_bounds = array<i64: 16, 128>}, {pipeline_mode = #tpu.pipeline_mode<synchronous>, transform_indices = @transform_1, window_bounds = array<i64: 128, 128>}, {pipeline_mode = #tpu.pipeline_mode<synchronous>, transform_indices = @transform_2, window_bounds = array<i64: 1, 128>}, {pipeline_mode = #tpu.pipeline_mode<synchronous>, transform_indices = @transform_3, window_bounds = array<i64: 128, 128>}, {pipeline_mode = #tpu.pipeline_mode<synchronous>, transform_indices = @transform_4, window_bounds = array<i64: 1, 128>}, {pipeline_mode = #tpu.pipeline_mode<synchronous>, transform_indices = @transform_5, window_bounds = array<i64: 128, 128>}, {pipeline_mode = #tpu.pipeline_mode<synchronous>, transform_indices = @transform_6, window_bounds = array<i64: 1, 128>}, {transform_indices = @transform_7, window_bounds = array<i64: 16, 128>}]} {
    %c0 = arith.constant 0 : index
    %c0_0 = arith.constant 0 : index
    %0 = vector.load %arg1[%c0, %c0_0] : memref<16x128xbf16, #tpu.memory_space<vmem>>, vector<16x128xbf16>
    %c0_1 = arith.constant 0 : index
    %c0_2 = arith.constant 0 : index
    %1 = vector.load %arg2[%c0_1, %c0_2] : memref<128x128xbf16, #tpu.memory_space<vmem>>, vector<128x128xbf16>
    %c0_3 = arith.constant 0 : index
    %c0_4 = arith.constant 0 : index
    %2 = vector.load %arg4[%c0_3, %c0_4] : memref<128x128xbf16, #tpu.memory_space<vmem>>, vector<128x128xbf16>
    %c0_5 = arith.constant 0 : index
    %c0_6 = arith.constant 0 : index
    %3 = vector.load %arg6[%c0_5, %c0_6] : memref<128x128xbf16, #tpu.memory_space<vmem>>, vector<128x128xbf16>
    %c0_7 = arith.constant 0 : index
    %c0_8 = arith.constant 0 : index
    %4 = vector.load %arg3[%c0_7, %c0_8] : memref<1x128xf32, #tpu.memory_space<vmem>>, vector<1x128xf32>
    %c0_9 = arith.constant 0 : index
    %c0_10 = arith.constant 0 : index
    %5 = vector.load %arg7[%c0_9, %c0_10] : memref<1x128xf32, #tpu.memory_space<vmem>>, vector<1x128xf32>
    %c0_11 = arith.constant 0 : index
    %c0_12 = arith.constant 0 : index
    %6 = vector.load %arg5[%c0_11, %c0_12] : memref<1x128xf32, #tpu.memory_space<vmem>>, vector<1x128xf32>
    %7 = vector.shape_cast %6 : vector<1x128xf32> to vector<1x128xf32>
    %8 = vector.broadcast %7 : vector<1x128xf32> to vector<16x128xf32>
    %cst = arith.constant dense<0.000000e+00> : vector<16x128xf32>
    %9 = tpu.matmul %0, %1, %cst {dimension_numbers = #tpu.dot_dimension_numbers<[1], [0], [0], [1], [0, 0, 1, 1], [], []>} : vector<16x128xbf16>, vector<128x128xbf16>, vector<16x128xf32> -> vector<16x128xf32>
    %10 = vector.broadcast %4 : vector<1x128xf32> to vector<16x128xf32>
    %11 = arith.addf %9, %10 : vector<16x128xf32>
    %cst_13 = arith.constant 0.000000e+00 : f32
    %12 = vector.broadcast %cst_13 : f32 to vector<16x128xf32>
    %13 = arith.maximumf %11, %12 : vector<16x128xf32>
    %14 = arith.truncf %13 : vector<16x128xf32> to vector<16x128xbf16>
    %c0_i32 = arith.constant 0 : i32
    %cst_14 = arith.constant dense<0.000000e+00> : vector<16x128xf32>
    %15 = tpu.matmul %14, %2, %cst_14 {dimension_numbers = #tpu.dot_dimension_numbers<[1], [0], [0], [1], [0, 0, 1, 1], [], []>} : vector<16x128xbf16>, vector<128x128xbf16>, vector<16x128xf32> -> vector<16x128xf32>
    %16 = arith.addf %15, %8 : vector<16x128xf32>
    %cst_15 = arith.constant 0.000000e+00 : f32
    %17 = vector.broadcast %cst_15 : f32 to vector<16x128xf32>
    %18 = arith.maximumf %16, %17 : vector<16x128xf32>
    %19 = arith.truncf %18 : vector<16x128xf32> to vector<16x128xbf16>
    %c1_i32 = arith.constant 1 : i32
    %cst_16 = arith.constant dense<0.000000e+00> : vector<16x128xf32>
    %20 = tpu.matmul %19, %2, %cst_16 {dimension_numbers = #tpu.dot_dimension_numbers<[1], [0], [0], [1], [0, 0, 1, 1], [], []>} : vector<16x128xbf16>, vector<128x128xbf16>, vector<16x128xf32> -> vector<16x128xf32>
    %21 = arith.addf %20, %8 : vector<16x128xf32>
    %cst_17 = arith.constant 0.000000e+00 : f32
    %22 = vector.broadcast %cst_17 : f32 to vector<16x128xf32>
    %23 = arith.maximumf %21, %22 : vector<16x128xf32>
    %24 = arith.truncf %23 : vector<16x128xf32> to vector<16x128xbf16>
    %c2_i32 = arith.constant 2 : i32
    %cst_18 = arith.constant dense<0.000000e+00> : vector<16x128xf32>
    %25 = tpu.matmul %24, %2, %cst_18 {dimension_numbers = #tpu.dot_dimension_numbers<[1], [0], [0], [1], [0, 0, 1, 1], [], []>} : vector<16x128xbf16>, vector<128x128xbf16>, vector<16x128xf32> -> vector<16x128xf32>
    %26 = arith.addf %25, %8 : vector<16x128xf32>
    %cst_19 = arith.constant 0.000000e+00 : f32
    %27 = vector.broadcast %cst_19 : f32 to vector<16x128xf32>
    %28 = arith.maximumf %26, %27 : vector<16x128xf32>
    %29 = arith.truncf %28 : vector<16x128xf32> to vector<16x128xbf16>
    %cst_20 = arith.constant dense<0.000000e+00> : vector<16x128xf32>
    %30 = tpu.matmul %29, %3, %cst_20 {dimension_numbers = #tpu.dot_dimension_numbers<[1], [0], [0], [1], [0, 0, 1, 1], [], []>} : vector<16x128xbf16>, vector<128x128xbf16>, vector<16x128xf32> -> vector<16x128xf32>
    %31 = vector.broadcast %5 : vector<1x128xf32> to vector<16x128xf32>
    %32 = arith.addf %30, %31 : vector<16x128xf32>
    %c0_21 = arith.constant 0 : index
    %c0_22 = arith.constant 0 : index
    %33 = vector.load %arg8[%c0_21, %c0_22] : memref<16x128xf32, #tpu.memory_space<vmem>>, vector<16x128xf32>
    tpu.vector_store %arg8[%c0_21, %c0_22], %32 {strides = array<i32>} : memref<16x128xf32, #tpu.memory_space<vmem>>, vector<16x128xf32>,
    return
  }
  func.func @transform_0(%arg0: i32) -> (i32, i32) {
    %c0_i32 = arith.constant 0 : i32
    %c0_i32_0 = arith.constant 0 : i32
    return %arg0, %c0_i32 : i32, i32
  }
  func.func @transform_1(%arg0: i32) -> (i32, i32) {
    %c0_i32 = arith.constant 0 : i32
    %c0_i32_0 = arith.constant 0 : i32
    %c0_i32_1 = arith.constant 0 : i32
    return %c0_i32, %c0_i32_0 : i32, i32
  }
  func.func @transform_2(%arg0: i32) -> (i32, i32) {
    %c0_i32 = arith.constant 0 : i32
    %c0_i32_0 = arith.constant 0 : i32
    %c0_i32_1 = arith.constant 0 : i32
    return %c0_i32, %c0_i32_0 : i32, i32
  }
  func.func @transform_3(%arg0: i32) -> (i32, i32) {
    %c0_i32 = arith.constant 0 : i32
    %c0_i32_0 = arith.constant 0 : i32
    %c0_i32_1 = arith.constant 0 : i32
    return %c0_i32, %c0_i32_0 : i32, i32
  }
  func.func @transform_4(%arg0: i32) -> (i32, i32) {
    %c0_i32 = arith.constant 0 : i32
    %c0_i32_0 = arith.constant 0 : i32
    %c0_i32_1 = arith.constant 0 : i32
    return %c0_i32, %c0_i32_0 : i32, i32
  }
  func.func @transform_5(%arg0: i32) -> (i32, i32) {
    %c0_i32 = arith.constant 0 : i32
    %c0_i32_0 = arith.constant 0 : i32
    %c0_i32_1 = arith.constant 0 : i32
    return %c0_i32, %c0_i32_0 : i32, i32
  }
  func.func @transform_6(%arg0: i32) -> (i32, i32) {
    %c0_i32 = arith.constant 0 : i32
    %c0_i32_0 = arith.constant 0 : i32
    %c0_i32_1 = arith.constant 0 : i32
    return %c0_i32, %c0_i32_0 : i32, i32
  }
  func.func @transform_7(%arg0: i32) -> (i32, i32) {
    %c0_i32 = arith.constant 0 : i32
    %c0_i32_0 = arith.constant 0 : i32
    return %arg0, %c0_i32 : i32, i32
  }
}

module attributes {stable_mosaic.version = 11 : i64} {
  func.func @mlp_kernel(%arg0: i32, %arg1: memref<16x128xbf16, #tpu.memory_space<vmem>>, %arg2: memref<128x128xbf16, #tpu.memory_space<vmem>>, %arg3: memref<1x128xf32, #tpu.memory_space<vmem>>, %arg4: memref<128x128xbf16, #tpu.memory_space<vmem>>, %arg5: memref<1x128xf32, #tpu.memory_space<vmem>>, %arg6: memref<128x128xbf16, #tpu.memory_space<vmem>>, %arg7: memref<1x128xf32, #tpu.memory_space<vmem>>, %arg8: memref<16x128xf32, #tpu.memory_space<vmem>>) attributes {dimension_semantics = [#tpu.dimension_semantics<parallel>], iteration_bounds = array<i64: 1>, scalar_prefetch = 0 : i64, scratch_operands = 0 : i64, tpu.core_type = #tpu.core_type<tc>, window_params = [{transform_indices = @transform_0, window_bounds = array<i64: 16, 128>}, {pipeline_mode = #tpu.pipeline_mode<synchronous>, transform_indices = @transform_1, window_bounds = array<i64: 128, 128>}, {pipeline_mode = #tpu.pipeline_mode<synchronous>, transform_indices = @transform_2, window_bounds = array<i64: 1, 128>}, {pipeline_mode = #tpu.pipeline_mode<synchronous>, transform_indices = @transform_3, window_bounds = array<i64: 128, 128>}, {pipeline_mode = #tpu.pipeline_mode<synchronous>, transform_indices = @transform_4, window_bounds = array<i64: 1, 128>}, {pipeline_mode = #tpu.pipeline_mode<synchronous>, transform_indices = @transform_5, window_bounds = array<i64: 128, 128>}, {pipeline_mode = #tpu.pipeline_mode<synchronous>, transform_indices = @transform_6, window_bounds = array<i64: 1, 128>}, {transform_indices = @transform_7, window_bounds = array<i64: 16, 128>}]} {
    %c0 = arith.constant 0 : index
    %c0_0 = arith.constant 0 : index
    %0 = vector.load %arg1[%c0, %c0_0] : memref<16x128xbf16, #tpu.memory_space<vmem>>, vector<16x128xbf16>
    %c0_1 = arith.constant 0 : index
    %c0_2 = arith.constant 0 : index
    %1 = vector.load %arg2[%c0_1, %c0_2] : memref<128x128xbf16, #tpu.memory_space<vmem>>, vector<128x128xbf16>
    %c0_3 = arith.constant 0 : index
    %c0_4 = arith.constant 0 : index
    %2 = vector.load %arg4[%c0_3, %c0_4] : memref<128x128xbf16, #tpu.memory_space<vmem>>, vector<128x128xbf16>
    %c0_5 = arith.constant 0 : index
    %c0_6 = arith.constant 0 : index
    %3 = vector.load %arg6[%c0_5, %c0_6] : memref<128x128xbf16, #tpu.memory_space<vmem>>, vector<128x128xbf16>
    %c0_7 = arith.constant 0 : index
    %c0_8 = arith.constant 0 : index
    %4 = vector.load %arg3[%c0_7, %c0_8] : memref<1x128xf32, #tpu.memory_space<vmem>>, vector<1x128xf32>
    %c0_9 = arith.constant 0 : index
    %c0_10 = arith.constant 0 : index
    %5 = vector.load %arg7[%c0_9, %c0_10] : memref<1x128xf32, #tpu.memory_space<vmem>>, vector<1x128xf32>
    %c0_11 = arith.constant 0 : index
    %c0_12 = arith.constant 0 : index
    %6 = vector.load %arg5[%c0_11, %c0_12] : memref<1x128xf32, #tpu.memory_space<vmem>>, vector<1x128xf32>
    %7 = vector.shape_cast %6 : vector<1x128xf32> to vector<1x128xf32>
    %8 = vector.broadcast %7 : vector<1x128xf32> to vector<16x128xf32>
    %cst = arith.constant dense<0.000000e+00> : vector<16x128xf32>
    %9 = tpu.matmul %0, %1, %cst {dimension_numbers = #tpu.dot_dimension_numbers<[1], [0], [0], [1], [0, 0, 1, 1], [], []>} : vector<16x128xbf16>, vector<128x128xbf16>, vector<16x128xf32> -> vector<16x128xf32>
    %10 = vector.broadcast %4 : vector<1x128xf32> to vector<16x128xf32>
    %11 = arith.addf %9, %10 : vector<16x128xf32>
    %cst_13 = arith.constant 0.000000e+00 : f32
    %12 = vector.broadcast %cst_13 : f32 to vector<16x128xf32>
    %13 = arith.maximumf %11, %12 : vector<16x128xf32>
    %14 = arith.truncf %13 : vector<16x128xf32> to vector<16x128xbf16>
    %c0_i32 = arith.constant 0 : i32
    %cst_14 = arith.constant dense<0.000000e+00> : vector<16x128xf32>
    %15 = tpu.matmul %14, %2, %cst_14 {dimension_numbers = #tpu.dot_dimension_numbers<[1], [0], [0], [1], [0, 0, 1, 1], [], []>} : vector<16x128xbf16>, vector<128x128xbf16>, vector<16x128xf32> -> vector<16x128xf32>
    %16 = arith.addf %15, %8 : vector<16x128xf32>
    %cst_15 = arith.constant 0.000000e+00 : f32
    %17 = vector.broadcast %cst_15 : f32 to vector<16x128xf32>
    %18 = arith.maximumf %16, %17 : vector<16x128xf32>
    %19 = arith.truncf %18 : vector<16x128xf32> to vector<16x128xbf16>
    %c1_i32 = arith.constant 1 : i32
    %cst_16 = arith.constant dense<0.000000e+00> : vector<16x128xf32>
    %20 = tpu.matmul %19, %2, %cst_16 {dimension_numbers = #tpu.dot_dimension_numbers<[1], [0], [0], [1], [0, 0, 1, 1], [], []>} : vector<16x128xbf16>, vector<128x128xbf16>, vector<16x128xf32> -> vector<16x128xf32>
    %21 = arith.addf %20, %8 : vector<16x128xf32>
    %cst_17 = arith.constant 0.000000e+00 : f32
    %22 = vector.broadcast %cst_17 : f32 to vector<16x128xf32>
    %23 = arith.maximumf %21, %22 : vector<16x128xf32>
    %24 = arith.truncf %23 : vector<16x128xf32> to vector<16x128xbf16>
    %c2_i32 = arith.constant 2 : i32
    %cst_18 = arith.constant dense<0.000000e+00> : vector<16x128xf32>
    %25 = tpu.matmul %24, %2, %cst_18 {dimension_numbers = #tpu.dot_dimension_numbers<[1], [0], [0], [1], [0, 0, 1, 1], [], []>} : vector<16x128xbf16>, vector<128x128xbf16>, vector<16x128xf32> -> vector<16x128xf32>
    %26 = arith.addf %25, %8 : vector<16x128xf32>
    %cst_19 = arith.constant 0.000000e+00 : f32
    %27 = vector.broadcast %cst_19 : f32 to vector<16x128xf32>
    %28 = arith.maximumf %26, %27 : vector<16x128xf32>
    %29 = arith.truncf %28 : vector<16x128xf32> to vector<16x128xbf16>
    %cst_20 = arith.constant dense<0.000000e+00> : vector<16x128xf32>
    %30 = tpu.matmul %29, %3, %cst_20 {dimension_numbers = #tpu.dot_dimension_numbers<[1], [0], [0], [1], [0, 0, 1, 1], [], []>} : vector<16x128xbf16>, vector<128x128xbf16>, vector<16x128xf32> -> vector<16x128xf32>
    %31 = vector.broadcast %5 : vector<1x128xf32> to vector<16x128xf32>
    %32 = arith.addf %30, %31 : vector<16x128xf32>
    %c0_21 = arith.constant 0 : index
    %c0_22 = arith.constant 0 : index
    %33 = vector.load %arg8[%c0_21, %c0_22] : memref<16x128xf32, #tpu.memory_space<vmem>>, vector<16x128xf32>
    tpu.vector_store %arg8[%c0_21, %c0_22], %32 {strides = array<i32>} : memref<16x128xf32, #tpu.memory_space<vmem>>, vector<16x128xf32>,
    return
  }
  func.func @transform_0(%arg0: i32) -> (i32, i32) {
    %c0_i32 = arith.constant 0 : i32
    %c0_i32_0 = arith.constant 0 : i32
    return %arg0, %c0_i32 : i32, i32
  }
  func.func @transform_1(%arg0: i32) -> (i32, i32) {
    %c0_i32 = arith.constant 0 : i32
    %c0_i32_0 = arith.constant 0 : i32
    %c0_i32_1 = arith.constant 0 : i32
    return %c0_i32, %c0_i32_0 : i32, i32
  }
  func.func @transform_2(%arg0: i32) -> (i32, i32) {
    %c0_i32 = arith.constant 0 : i32
    %c0_i32_0 = arith.constant 0 : i32
    %c0_i32_1 = arith.constant 0 : i32
    return %c0_i32, %c0_i32_0 : i32, i32
  }
  func.func @transform_3(%arg0: i32) -> (i32, i32) {
    %c0_i32 = arith.constant 0 : i32
    %c0_i32_0 = arith.constant 0 : i32
    %c0_i32_1 = arith.constant 0 : i32
    return %c0_i32, %c0_i32_0 : i32, i32
  }
  func.func @transform_4(%arg0: i32) -> (i32, i32) {
    %c0_i32 = arith.constant 0 : i32
    %c0_i32_0 = arith.constant 0 : i32
    %c0_i32_1 = arith.constant 0 : i32
    return %c0_i32, %c0_i32_0 : i32, i32
  }
  func.func @transform_5(%arg0: i32) -> (i32, i32) {
    %c0_i32 = arith.constant 0 : i32
    %c0_i32_0 = arith.constant 0 : i32
    %c0_i32_1 = arith.constant 0 : i32
    return %c0_i32, %c0_i32_0 : i32, i32
  }
  func.func @transform_6(%arg0: i32) -> (i32, i32) {
    %c0_i32 = arith.constant 0 : i32
    %c0_i32_0 = arith.constant 0 : i32
    %c0_i32_1 = arith.constant 0 : i32
    return %c0_i32, %c0_i32_0 : i32, i32
  }
  func.func @transform_7(%arg0: i32) -> (i32, i32) {
    %c0_i32 = arith.constant 0 : i32
    %c0_i32_0 = arith.constant 0 : i32
    return %arg0, %c0_i32 : i32, i32
  }
}

</mosaic_0001>

<bundles_post_ra>
// kernel: tpu_custom_call.1
= control target key start
LH: loop header
LB: loop body
LE: loop exit
PB: predicated region body
PF: predicated region fallthrough
CT: control target
= control target key end

     0   :  { %12 = vsyncpa [#allocation3], 0  ;;  %s1085_s0 = inlined_call_operand.hbm [shape: bf16[16,128], index: 0, kind: input, shape index: {}]   ;;  %s1086_s1 = inlined_call_operand.hbm [shape: bf16[128,128], index: 1, kind: input, shape index: {}]   ;;  %s1087_s2 = inlined_call_operand.vmem [shape: f32[1,128], index: 2, kind: input, shape index: {}]   ;;  %s1088_s3 = inlined_call_operand.hbm [shape: bf16[128,128], index: 3, kind: input, shape index: {}]   ;;  %s1089_s4 = inlined_call_operand.vmem [shape: f32[1,128], index: 4, kind: input, shape index: {}]   ;;  %s1090_s5 = inlined_call_operand.hbm [shape: bf16[128,128], index: 5, kind: input, shape index: {}]   ;;  %s1091_s6 = inlined_call_operand.vmem [shape: f32[1,128], index: 6, kind: input, shape index: {}]   ;;  %s1092_s7 = inlined_call_operand.hbm [shape: f32[16,128], index: 7, kind: output, shape index: {}]  }
   0x1   :  { %13 = vsyncpa [#allocation6], 0 }
   0x2   :  { %14 = vsyncpa [#allocation9], 0 }
   0x3   :  { %15 = vsyncpa [#allocation4], 0  ;;  %s869_s24 = smov [#allocation5]   ;;  %s870_s26 = smov [#allocation2]  }
   0x4   :  { %s33_s25 = sshll.u32 %s869_s24, 4  ;;  %s21_s27 = sshll.u32 %s870_s26, 4  ;;  %s34_s25 = int_to_ptr.vmem [resolvable:$true] %s33_s25  ;;  %s920_s27 = int_to_ptr.vmem [resolvable:$true] %s21_s27 }
   0x5   :  { %s751_s30 = scalar_lea.hbm %s1086_s1, 1024 }
   0x6   :  { %p752_p0 = scmp.ne.s32.totalorder %s1086_s1, %s751_s30  ;;  %p755_p1 = scmp.lt.u32.totalorder %s751_s30, %s1086_s1 }
   0x8   :  { %p757_p2 = pnand %p755_p1, %p752_p0 }
   0xa   :  { %760 = shalt.err (!%p757_p2)
}
   0xb   :  { %s761_s12 = scalar_lea.vmem %s34_s25, 1024  ;;  %p766_p4 = scmp.lt.s32.totalorder %s34_s25, %s34_s25 }
   0xc   :  { %p762_p3 = scmp.ne.s32.totalorder %s34_s25, %s761_s12  ;;  %p767_p5 = scmp.lt.s32.totalorder %s761_s12, %s761_s12 }
   0xe   :  { %p768_p6 = por %p767_p5, %p766_p4 }
  0x10   :  { %p769_p7 = pnand %p768_p6, %p762_p3 }
  0x12   :  { %772 = shalt.err (!%p769_p7)
}
  0x13   :  { %s871_s13 = smov 64   ;;  %s872_s14 = smov 4  }
  0x14   :  { %39 = dma.hbm_to_vmem [thread:$0]  %s1086_s1, 1024, %s34_s25, [#allocation6], %s871_s13, %s871_s13, %s872_s14  }
  0x15   :  { %s773_s19 = scalar_lea.hbm %s1085_s0, 128 }
  0x16   :  { %p774_p8 = scmp.ne.s32.totalorder %s1085_s0, %s773_s19  ;;  %p777_p9 = scmp.lt.u32.totalorder %s773_s19, %s1085_s0 }
  0x18   :  { %p779_p10 = pnand %p777_p9, %p774_p8 }
  0x1a   :  { %782 = shalt.err (!%p779_p10)
}
  0x1b   :  { %s783_s24 = scalar_lea.vmem %s920_s27, 128  ;;  %p788_p12 = scmp.lt.s32.totalorder %s920_s27, %s920_s27 }
  0x1c   :  { %p784_p11 = scmp.ne.s32.totalorder %s920_s27, %s783_s24  ;;  %p789_p13 = scmp.lt.s32.totalorder %s783_s24, %s783_s24 }
  0x1e   :  { %p790_p0 = por %p789_p13, %p788_p12 }
  0x20   :  { %p791_p1 = pnand %p790_p0, %p784_p11 }
  0x22   :  { %794 = shalt.err (!%p791_p1)
}
  0x23   :  { %27 = dma.hbm_to_vmem [thread:$0]  %s1085_s0, 128, %s920_s27, [#allocation3], %s871_s13, %s871_s13, %s872_s14  }
  0x24   :  { %s873_s26 = smov [#allocation7]   ;;  %s874_s29 = smov [#allocation8]  }
  0x25   :  { %s47_s28 = sshll.u32 %s873_s26, 4  ;;  %s61_s30 = sshll.u32 %s874_s29, 4  ;;  %s48_s28 = int_to_ptr.vmem [resolvable:$true] %s47_s28  ;;  %s957_s30 = int_to_ptr.vmem [resolvable:$true] %s61_s30 }
  0x26   :  { %s795_s10 = scalar_lea.hbm %s1088_s3, 1024 }
  0x27   :  { %p796_p2 = scmp.ne.s32.totalorder %s1088_s3, %s795_s10  ;;  %p799_p3 = scmp.lt.u32.totalorder %s795_s10, %s1088_s3 }
  0x29   :  { %p801_p4 = pnand %p799_p3, %p796_p2 }
  0x2b   :  { %804 = shalt.err (!%p801_p4)
}
  0x2c   :  { %s805_s0 = scalar_lea.vmem %s48_s28, 1024  ;;  %p810_p6 = scmp.lt.s32.totalorder %s48_s28, %s48_s28 }
  0x2d   :  { %p806_p5 = scmp.ne.s32.totalorder %s48_s28, %s805_s0  ;;  %p811_p7 = scmp.lt.s32.totalorder %s805_s0, %s805_s0 }
  0x2f   :  { %p812_p8 = por %p811_p7, %p810_p6 }
  0x31   :  { %p813_p9 = pnand %p812_p8, %p806_p5 }
  0x33   :  { %816 = shalt.err (!%p813_p9)
}
  0x34   :  { %53 = dma.hbm_to_vmem [thread:$0]  %s1088_s3, 1024, %s48_s28, [#allocation6], %s871_s13, %s871_s13, %s872_s14  }
  0x35   :  { %s817_s20 = scalar_lea.hbm %s1090_s5, 1024 }
  0x36   :  { %p818_p10 = scmp.ne.s32.totalorder %s1090_s5, %s817_s20  ;;  %p821_p11 = scmp.lt.u32.totalorder %s817_s20, %s1090_s5 }
  0x38   :  { %p823_p12 = pnand %p821_p11, %p818_p10 }
  0x3a   :  { %826 = shalt.err (!%p823_p12)
}
  0x3b   :  { %s827_s1 = scalar_lea.vmem %s957_s30, 1024  ;;  %p832_p0 = scmp.lt.s32.totalorder %s957_s30, %s957_s30 }
  0x3c   :  { %p828_p13 = scmp.ne.s32.totalorder %s957_s30, %s827_s1  ;;  %p833_p1 = scmp.lt.s32.totalorder %s827_s1, %s827_s1 }
  0x3e   :  { %p834_p2 = por %p833_p1, %p832_p0 }
  0x40   :  { %p835_p3 = pnand %p834_p2, %p828_p13 }
  0x42   :  { %838 = shalt.err (!%p835_p3)
}
  0x43   :  { %67 = dma.hbm_to_vmem [thread:$0]  %s1090_s5, 1024, %s957_s30, [#allocation9], %s871_s13, %s871_s13, %s872_s14  }
  0x44   :  { %861 = dma.done.wait [#allocation3], 128  }
  0x45   :  { %862 = vsyncadd [#allocation3], 4294967168 }
  0x46   :  { %863 = dma.done.wait [#allocation6], 2048  }
  0x47   :  { %864 = vsyncadd [#allocation6], 4294965248 }
  0x48   :  { %865 = dma.done.wait [#allocation9], 1024  }
  0x49   :  { %866 = vsyncadd [#allocation9], 4294966272  ;;  %v875_v0 = vmov 0.0   ;;  %vm876_vm0 = vmmov 0   ;;  %v726_v1 = vld [vmem:[#allocation5] sm:$0xff]   ;;  %v727_v2 = vld [vmem:[#allocation5 + $0x8] sm:$0xff]  }
  0x4a   :  { %615 = vmatprep.subr.bf16.mxu0 %v875_v0  ;;  %631 = vmatprep.mubr.msk.bf16.mxu0 %vm876_vm0, %v875_v0  ;;  %v728_v3 = vld [vmem:[#allocation5 + $0x10] sm:$0xff]   ;;  %v1002_v4 = vld [vmem:[#allocation7] sm:$0xff]   ;;  %v729_v5 = vld [vmem:[#allocation5 + $0x18] sm:$0xff]   ;;  %s877_s28 = smov [#allocation10]  }
  0x4b   :  { %635 = vmatprep.subr.bf16.mxu1 %v875_v0  ;;  %651 = vmatprep.mubr.msk.bf16.mxu1 %vm876_vm0, %v875_v0  ;;  %v1006_v6 = vld [vmem:[#allocation7 + $0x8] sm:$0xff]   ;;  %v730_v7 = vld [vmem:[#allocation5 + $0x20] sm:$0xff]   ;;  %v1011_v8 = vld [vmem:[#allocation7 + $0x10] sm:$0xff]   ;;  %s528_s29 = sshll.u32 %s877_s28, 4  ;;  %s529_s29 = int_to_ptr.vmem [resolvable:$true] %s528_s29 }
  0x4c   :  { %616 = vmatpush3.bf16.msra.mxu0 %v726_v1  ;;  %636 = vmatpush3.bf16.msra.mxu1 %v1002_v4  ;;  %v731_v9 = vld [vmem:[#allocation5 + $0x28] sm:$0xff]   ;;  %v1014_v10 = vld [vmem:[#allocation7 + $0x18] sm:$0xff]   ;;  %v732_v11 = vld [vmem:[#allocation5 + $0x30] sm:$0xff]   ;;  %s839_s30 = scalar_lea.vmem %s529_s29, 256  ;;  %p844_p5 = scmp.lt.s32.totalorder %s529_s29, %s529_s29 }
  0x4d   :  { %617 = vmatprep.subr.bf16.mxu0 %v875_v0  ;;  %637 = vmatprep.subr.bf16.mxu1 %v875_v0  ;;  %v739_v12 = vld [vmem:[#allocation7 + $0x20] sm:$0xff]   ;;  %v733_v13 = vld [vmem:[#allocation5 + $0x38] sm:$0xff]   ;;  %v740_v14 = vld [vmem:[#allocation7 + $0x28] sm:$0xff]   ;;  %p840_p4 = scmp.ne.s32.totalorder %s529_s29, %s839_s30  ;;  %p845_p6 = scmp.lt.s32.totalorder %s839_s30, %s839_s30 }
  0x4e   :  { %v734_v15 = vld [vmem:[#allocation2] sm:$0xff]   ;;  %v741_v16 = vld [vmem:[#allocation7 + $0x30] sm:$0xff]   ;;  %v743_v38 = vld [vmem:[#allocation8] sm:$0xff]  }
  0x4f   :  { %v742_v17 = vld [vmem:[#allocation7 + $0x38] sm:$0xff]   ;;  %v744_v39 = vld [vmem:[#allocation8 + $0x8] sm:$0xff]   ;;  %v745_v40 = vld [vmem:[#allocation8 + $0x10] sm:$0xff]   ;;  %p846_p7 = por %p845_p6, %p844_p5 }
  0x50   :  { %618 = vmatpush3.bf16.msra.mxu0 %v727_v2  ;;  %638 = vmatpush3.bf16.msra.mxu1 %v1006_v6  ;;  %v543_v18 = vld [vmem:[%s1087_s2] ss:$0 sm:$0xff]  ;;  %v747_v42 = vld [vmem:[#allocation8 + $0x20] sm:$0xff]   ;;  %v748_v43 = vld [vmem:[#allocation8 + $0x28] sm:$0xff]  }
  0x51   :  { %619 = vmatprep.subr.bf16.mxu0 %v875_v0  ;;  %639 = vmatprep.subr.bf16.mxu1 %v875_v0  ;;  %v542_v28 = vld [vmem:[%s1089_s4] ss:$0 sm:$0xff]  ;;  %v749_v53 = vld [vmem:[#allocation8 + $0x30] sm:$0xff]   ;;  %p847_p8 = pnand %p846_p7, %p840_p4 }
  0x52   :  { %v746_v41 = vld [vmem:[#allocation8 + $0x18] sm:$0xff]  }
  0x53   :  { %v750_v54 = vld [vmem:[#allocation8 + $0x38] sm:$0xff]  }
  0x54   :  { %620 = vmatpush3.bf16.msra.mxu0 %v728_v3  ;;  %640 = vmatpush3.bf16.msra.mxu1 %v1011_v8  ;;  %v561_v1 = vld [vmem:[%s1091_s6] ss:$0 sm:$0xff] }
  0x55   :  { %621 = vmatprep.subr.bf16.mxu0 %v875_v0  ;;  %641 = vmatprep.subr.bf16.mxu1 %v875_v0 }
  0x58   :  { %622 = vmatpush3.bf16.msra.mxu0 %v729_v5  ;;  %642 = vmatpush3.bf16.msra.mxu1 %v1014_v10 }
  0x59   :  { %623 = vmatprep.subr.bf16.mxu0 %v875_v0  ;;  %643 = vmatprep.subr.bf16.mxu1 %v875_v0 }
  0x5c   :  { %624 = vmatpush3.bf16.msra.mxu0 %v730_v7  ;;  %644 = vmatpush3.bf16.msra.mxu1 %v739_v12 }
  0x5d   :  { %625 = vmatprep.subr.bf16.mxu0 %v875_v0  ;;  %645 = vmatprep.subr.bf16.mxu1 %v875_v0 }
  0x60   :  { %626 = vmatpush3.bf16.msra.mxu0 %v731_v9  ;;  %646 = vmatpush3.bf16.msra.mxu1 %v740_v14 }
  0x61   :  { %627 = vmatprep.subr.bf16.mxu0 %v875_v0  ;;  %647 = vmatprep.subr.bf16.mxu1 %v875_v0 }
  0x64   :  { %628 = vmatpush3.bf16.msra.mxu0 %v732_v11  ;;  %648 = vmatpush3.bf16.msra.mxu1 %v741_v16 }
  0x65   :  { %629 = vmatprep.subr.bf16.mxu0 %v875_v0  ;;  %649 = vmatprep.subr.bf16.mxu1 %v875_v0 }
  0x68   :  { %630 = vmatpush3.bf16.msra.mxu0 %v733_v13  ;;  %650 = vmatpush3.bf16.msra.mxu1 %v742_v17 }
  0x69   :  { %655 = vmatprep.subr.bf16.mxu0 %v875_v0  ;;  %675 = vmatprep.subr.bf16.mxu1 %v875_v0 }
  0x6b   :  { %632 = vmatmul.mubr.bf16.vlgmr.msra.gmra.mrb[0].mxu0 %v734_v15 }
  0x6c   :  { %656 = vmatpush3.bf16.msra.mxu0 %v1002_v4  ;;  %671 = vmatprep.mubr.msk.bf16.mxu0 %vm876_vm0, %v875_v0 }
  0x6d   :  { %657 = vmatprep.subr.bf16.mxu0 %v875_v0 }
  0x70   :  { %658 = vmatpush3.bf16.msra.mxu0 %v1006_v6 }
  0x71   :  { %659 = vmatprep.subr.bf16.mxu0 %v875_v0 }
  0x74   :  { %660 = vmatpush3.bf16.msra.mxu0 %v1011_v8 }
  0x75   :  { %661 = vmatprep.subr.bf16.mxu0 %v875_v0 }
  0x78   :  { %662 = vmatpush3.bf16.msra.mxu0 %v1014_v10 }
  0x79   :  { %663 = vmatprep.subr.bf16.mxu0 %v875_v0 }
  0x7c   :  { %664 = vmatpush3.bf16.msra.mxu0 %v739_v12 }
  0x7d   :  { %665 = vmatprep.subr.bf16.mxu0 %v875_v0 }
  0x80   :  { %666 = vmatpush3.bf16.msra.mxu0 %v740_v14 }
  0x81   :  { %667 = vmatprep.subr.bf16.mxu0 %v875_v0 }
  0x84   :  { %668 = vmatpush3.bf16.msra.mxu0 %v741_v16 }
  0x85   :  { %669 = vmatprep.subr.bf16.mxu0 %v875_v0 }
  0x88   :  { %670 = vmatpush3.bf16.msra.mxu0 %v742_v17 }
  0x89   :  { %695 = vmatprep.subr.bf16.mxu0 %v875_v0 }
 0x13e   :  { %v236_v19 = vpop.f32.mrb[0].mxu0 }
 0x13f   :  { %v237_v20 = vadd.f32 %v543_v18, %v236_v19  ;;  %v633_v21 = vpop.f32.mrb[1].mxu0 }
 0x140   :  { %v239_v22 = vpop.f32.mrb[2].mxu0 }
 0x141   :  { %v240_v23 = vadd.f32 %v543_v18, %v239_v22  ;;  %v634_v24 = vpop.f32.mrb[3].mxu0  ;;  %v243_v25 = vmax.f32 %v237_v20, 0.0 }
 0x143   :  { %v244_v26 = vmax.f32 %v240_v23, 0.0 }
 0x145   :  { %v245_v27 = vpack.c.bf16 %v244_v26, %v243_v25 }
 0x147   :  { %652 = vmatmul.mubr.bf16.vlgmr.msra.gmra.mrb[0].mxu1 %v245_v27 }
 0x148   :  { %676 = vmatpush3.bf16.msra.mxu1 %v1002_v4  ;;  %691 = vmatprep.mubr.msk.bf16.mxu1 %vm876_vm0, %v875_v0 }
 0x149   :  { %677 = vmatprep.subr.bf16.mxu1 %v875_v0 }
 0x14c   :  { %678 = vmatpush3.bf16.msra.mxu1 %v1006_v6 }
 0x14d   :  { %679 = vmatprep.subr.bf16.mxu1 %v875_v0 }
 0x150   :  { %680 = vmatpush3.bf16.msra.mxu1 %v1011_v8 }
 0x151   :  { %681 = vmatprep.subr.bf16.mxu1 %v875_v0 }
 0x154   :  { %682 = vmatpush3.bf16.msra.mxu1 %v1014_v10 }
 0x155   :  { %683 = vmatprep.subr.bf16.mxu1 %v875_v0 }
 0x158   :  { %684 = vmatpush3.bf16.msra.mxu1 %v739_v12 }
 0x159   :  { %685 = vmatprep.subr.bf16.mxu1 %v875_v0 }
 0x15c   :  { %686 = vmatpush3.bf16.msra.mxu1 %v740_v14 }
 0x15d   :  { %687 = vmatprep.subr.bf16.mxu1 %v875_v0 }
 0x160   :  { %688 = vmatpush3.bf16.msra.mxu1 %v741_v16 }
 0x161   :  { %689 = vmatprep.subr.bf16.mxu1 %v875_v0 }
 0x164   :  { %690 = vmatpush3.bf16.msra.mxu1 %v742_v17 }
 0x21a   :  { %v328_v29 = vpop.f32.mrb[0].mxu1 }
 0x21b   :  { %v329_v30 = vadd.f32 %v542_v28, %v328_v29  ;;  %v653_v31 = vpop.f32.mrb[1].mxu1 }
 0x21c   :  { %v331_v32 = vpop.f32.mrb[2].mxu1 }
 0x21d   :  { %v332_v33 = vadd.f32 %v542_v28, %v331_v32  ;;  %v654_v34 = vpop.f32.mrb[3].mxu1  ;;  %v335_v35 = vmax.f32 %v329_v30, 0.0 }
 0x21f   :  { %v336_v36 = vmax.f32 %v332_v33, 0.0 }
 0x221   :  { %v337_v37 = vpack.c.bf16 %v336_v36, %v335_v35 }
 0x223   :  { %672 = vmatmul.mubr.bf16.vlgmr.msra.gmra.mrb[4].mxu0 %v337_v37 }
 0x224   :  { %711 = vmatprep.mubr.msk.bf16.mxu0 %vm876_vm0, %v875_v0  ;;  %696 = vmatpush3.bf16.msra.mxu0 %v743_v38 }
 0x225   :  { %697 = vmatprep.subr.bf16.mxu0 %v875_v0 }
 0x228   :  { %698 = vmatpush3.bf16.msra.mxu0 %v744_v39 }
 0x229   :  { %699 = vmatprep.subr.bf16.mxu0 %v875_v0 }
 0x22c   :  { %700 = vmatpush3.bf16.msra.mxu0 %v745_v40 }
 0x22d   :  { %701 = vmatprep.subr.bf16.mxu0 %v875_v0 }
 0x230   :  { %702 = vmatpush3.bf16.msra.mxu0 %v746_v41 }
 0x231   :  { %703 = vmatprep.subr.bf16.mxu0 %v875_v0 }
 0x234   :  { %704 = vmatpush3.bf16.msra.mxu0 %v747_v42 }
 0x235   :  { %705 = vmatprep.subr.bf16.mxu0 %v875_v0 }
 0x238   :  { %706 = vmatpush3.bf16.msra.mxu0 %v748_v43 }
 0x239   :  { %707 = vmatprep.subr.bf16.mxu0 %v875_v0 }
 0x23c   :  { %708 = vmatpush3.bf16.msra.mxu0 %v749_v53 }
 0x23d   :  { %709 = vmatprep.subr.bf16.mxu0 %v875_v0 }
 0x240   :  { %710 = vmatpush3.bf16.msra.mxu0 %v750_v54 }
 0x2f6   :  { %v372_v44 = vpop.f32.mrb[4].mxu0 }
 0x2f7   :  { %v373_v45 = vadd.f32 %v542_v28, %v372_v44  ;;  %v673_v46 = vpop.f32.mrb[5].mxu0 }
 0x2f8   :  { %v375_v47 = vpop.f32.mrb[6].mxu0 }
 0x2f9   :  { %v376_v48 = vadd.f32 %v542_v28, %v375_v47  ;;  %v674_v49 = vpop.f32.mrb[7].mxu0  ;;  %v379_v50 = vmax.f32 %v373_v45, 0.0 }
 0x2fb   :  { %v380_v51 = vmax.f32 %v376_v48, 0.0 }
 0x2fd   :  { %v381_v52 = vpack.c.bf16 %v380_v51, %v379_v50 }
 0x2ff   :  { %692 = vmatmul.mubr.bf16.vlgmr.msra.gmra.mrb[4].mxu1 %v381_v52 }
 0x3d2   :  { %v416_v55 = vpop.f32.mrb[4].mxu1 }
 0x3d3   :  { %v417_v56 = vadd.f32 %v542_v28, %v416_v55  ;;  %v693_v57 = vpop.f32.mrb[5].mxu1 }
 0x3d4   :  { %v419_v58 = vpop.f32.mrb[6].mxu1 }
 0x3d5   :  { %v420_v59 = vadd.f32 %v542_v28, %v419_v58  ;;  %v694_v60 = vpop.f32.mrb[7].mxu1  ;;  %v423_v61 = vmax.f32 %v417_v56, 0.0 }
 0x3d7   :  { %v424_v62 = vmax.f32 %v420_v59, 0.0 }
 0x3d9   :  { %v425_v63 = vpack.c.bf16 %v424_v62, %v423_v61 }
 0x3db   :  { %712 = vmatmul.mubr.bf16.vlgmr.msra.gmra.mrb[8].mxu0 %v425_v63 }
 0x4ae   :  { %v514_v2 = vpop.f32.mrb[8].mxu0 }
 0x4af   :  { %v515_v0 = vadd.f32 %v561_v1, %v514_v2  ;;  %v713_v3 = vpop.f32.mrb[9].mxu0 }
 0x4b0   :  { %v517_v4 = vpop.f32.mrb[10].mxu0 }
 0x4b1   :  { %521 = vst [vmem:[#allocation10] sm:$0xff] %v515_v0  ;;  %v518_v5 = vadd.f32 %v561_v1, %v517_v4  ;;  %v714_v6 = vpop.f32.mrb[11].mxu0 }
 0x4b3   :  { %522 = vst [vmem:[#allocation10 + $0x8] sm:$0xff] %v518_v5 }
 0x4b4   :  { %850 = shalt.err (!%p847_p8)
}
 0x4b5   :  { %s851_s9 = scalar_lea.hbm %s1092_s7, 256 }
 0x4b6   :  { %p852_p9 = scmp.ne.s32.totalorder %s1092_s7, %s851_s9  ;;  %p855_p10 = scmp.lt.u32.totalorder %s851_s9, %s1092_s7 }
 0x4b8   :  { %p857_p11 = pnand %p855_p10, %p852_p9 }
 0x4ba   :  { %860 = shalt.err (!%p857_p11)
}
 0x4bb   :  { %s878_s16 = smov 128   ;;  %s879_s0 = smov 8  }
 0x4bc   :  { %534 = dma.vmem_to_hbm [thread:$0]  %s529_s29, 256, %s1092_s7, [#allocation4], %s878_s16, %s878_s16, %s879_s0  }
 0x4bd   :  { %867 = dma.done.wait [#allocation4], 256  }
 0x4be   :  { %868 = vsyncadd [#allocation4], 4294967040 }
 0x4bf   :  { %538 = vsyncpa [#allocation3], 1 }
 0x4c0   :  { %539 = vsyncpa [#allocation6], 1 }
 0x4c1   :  { %540 = vsyncpa [#allocation9], 1 }
 0x4c2   :  { %541 = vsyncpa [#allocation4], 1 }

// kernel: tpu_custom_call.1
= control target key start
LH: loop header
LB: loop body
LE: loop exit
PB: predicated region body
PF: predicated region fallthrough
CT: control target
= control target key end

     0   :  { %12 = vsyncpa [#allocation3], 0  ;;  %s1085_s0 = inlined_call_operand.hbm [shape: bf16[16,128], index: 0, kind: input, shape index: {}]   ;;  %s1086_s1 = inlined_call_operand.hbm [shape: bf16[128,128], index: 1, kind: input, shape index: {}]   ;;  %s1087_s2 = inlined_call_operand.vmem [shape: f32[1,128], index: 2, kind: input, shape index: {}]   ;;  %s1088_s3 = inlined_call_operand.hbm [shape: bf16[128,128], index: 3, kind: input, shape index: {}]   ;;  %s1089_s4 = inlined_call_operand.vmem [shape: f32[1,128], index: 4, kind: input, shape index: {}]   ;;  %s1090_s5 = inlined_call_operand.hbm [shape: bf16[128,128], index: 5, kind: input, shape index: {}]   ;;  %s1091_s6 = inlined_call_operand.vmem [shape: f32[1,128], index: 6, kind: input, shape index: {}]   ;;  %s1092_s7 = inlined_call_operand.hbm [shape: f32[16,128], index: 7, kind: output, shape index: {}]  }
   0x1   :  { %13 = vsyncpa [#allocation6], 0 }
   0x2   :  { %14 = vsyncpa [#allocation9], 0 }
   0x3   :  { %15 = vsyncpa [#allocation4], 0  ;;  %s869_s24 = smov [#allocation5]   ;;  %s870_s26 = smov [#allocation2]  }
   0x4   :  { %s33_s25 = sshll.u32 %s869_s24, 4  ;;  %s21_s27 = sshll.u32 %s870_s26, 4  ;;  %s34_s25 = int_to_ptr.vmem [resolvable:$true] %s33_s25  ;;  %s920_s27 = int_to_ptr.vmem [resolvable:$true] %s21_s27 }
   0x5   :  { %s751_s30 = scalar_lea.hbm %s1086_s1, 1024 }
   0x6   :  { %p752_p0 = scmp.ne.s32.totalorder %s1086_s1, %s751_s30  ;;  %p755_p1 = scmp.lt.u32.totalorder %s751_s30, %s1086_s1 }
   0x8   :  { %p757_p2 = pnand %p755_p1, %p752_p0 }
   0xa   :  { %760 = shalt.err (!%p757_p2)
}
   0xb   :  { %s761_s12 = scalar_lea.vmem %s34_s25, 1024  ;;  %p766_p4 = scmp.lt.s32.totalorder %s34_s25, %s34_s25 }
   0xc   :  { %p762_p3 = scmp.ne.s32.totalorder %s34_s25, %s761_s12  ;;  %p767_p5 = scmp.lt.s32.totalorder %s761_s12, %s761_s12 }
   0xe   :  { %p768_p6 = por %p767_p5, %p766_p4 }
  0x10   :  { %p769_p7 = pnand %p768_p6, %p762_p3 }
  0x12   :  { %772 = shalt.err (!%p769_p7)
}
  0x13   :  { %s871_s13 = smov 64   ;;  %s872_s14 = smov 4  }
  0x14   :  { %39 = dma.hbm_to_vmem [thread:$0]  %s1086_s1, 1024, %s34_s25, [#allocation6], %s871_s13, %s871_s13, %s872_s14  }
  0x15   :  { %s773_s19 = scalar_lea.hbm %s1085_s0, 128 }
  0x16   :  { %p774_p8 = scmp.ne.s32.totalorder %s1085_s0, %s773_s19  ;;  %p777_p9 = scmp.lt.u32.totalorder %s773_s19, %s1085_s0 }
  0x18   :  { %p779_p10 = pnand %p777_p9, %p774_p8 }
  0x1a   :  { %782 = shalt.err (!%p779_p10)
}
  0x1b   :  { %s783_s24 = scalar_lea.vmem %s920_s27, 128  ;;  %p788_p12 = scmp.lt.s32.totalorder %s920_s27, %s920_s27 }
  0x1c   :  { %p784_p11 = scmp.ne.s32.totalorder %s920_s27, %s783_s24  ;;  %p789_p13 = scmp.lt.s32.totalorder %s783_s24, %s783_s24 }
  0x1e   :  { %p790_p0 = por %p789_p13, %p788_p12 }
  0x20   :  { %p791_p1 = pnand %p790_p0, %p784_p11 }
  0x22   :  { %794 = shalt.err (!%p791_p1)
}
  0x23   :  { %27 = dma.hbm_to_vmem [thread:$0]  %s1085_s0, 128, %s920_s27, [#allocation3], %s871_s13, %s871_s13, %s872_s14  }
  0x24   :  { %s873_s26 = smov [#allocation7]   ;;  %s874_s29 = smov [#allocation8]  }
  0x25   :  { %s47_s28 = sshll.u32 %s873_s26, 4  ;;  %s61_s30 = sshll.u32 %s874_s29, 4  ;;  %s48_s28 = int_to_ptr.vmem [resolvable:$true] %s47_s28  ;;  %s957_s30 = int_to_ptr.vmem [resolvable:$true] %s61_s30 }
  0x26   :  { %s795_s10 = scalar_lea.hbm %s1088_s3, 1024 }
  0x27   :  { %p796_p2 = scmp.ne.s32.totalorder %s1088_s3, %s795_s10  ;;  %p799_p3 = scmp.lt.u32.totalorder %s795_s10, %s1088_s3 }
  0x29   :  { %p801_p4 = pnand %p799_p3, %p796_p2 }
  0x2b   :  { %804 = shalt.err (!%p801_p4)
}
  0x2c   :  { %s805_s0 = scalar_lea.vmem %s48_s28, 1024  ;;  %p810_p6 = scmp.lt.s32.totalorder %s48_s28, %s48_s28 }
  0x2d   :  { %p806_p5 = scmp.ne.s32.totalorder %s48_s28, %s805_s0  ;;  %p811_p7 = scmp.lt.s32.totalorder %s805_s0, %s805_s0 }
  0x2f   :  { %p812_p8 = por %p811_p7, %p810_p6 }
  0x31   :  { %p813_p9 = pnand %p812_p8, %p806_p5 }
  0x33   :  { %816 = shalt.err (!%p813_p9)
}
  0x34   :  { %53 = dma.hbm_to_vmem [thread:$0]  %s1088_s3, 1024, %s48_s28, [#allocation6], %s871_s13, %s871_s13, %s872_s14  }
  0x35   :  { %s817_s20 = scalar_lea.hbm %s1090_s5, 1024 }
  0x36   :  { %p818_p10 = scmp.ne.s32.totalorder %s1090_s5, %s817_s20  ;;  %p821_p11 = scmp.lt.u32.totalorder %s817_s20, %s1090_s5 }
  0x38   :  { %p823_p12 = pnand %p821_p11, %p818_p10 }
  0x3a   :  { %826 = shalt.err (!%p823_p12)
}
  0x3b   :  { %s827_s1 = scalar_lea.vmem %s957_s30, 1024  ;;  %p832_p0 = scmp.lt.s32.totalorder %s957_s30, %s957_s30 }
  0x3c   :  { %p828_p13 = scmp.ne.s32.totalorder %s957_s30, %s827_s1  ;;  %p833_p1 = scmp.lt.s32.totalorder %s827_s1, %s827_s1 }
  0x3e   :  { %p834_p2 = por %p833_p1, %p832_p0 }
  0x40   :  { %p835_p3 = pnand %p834_p2, %p828_p13 }
  0x42   :  { %838 = shalt.err (!%p835_p3)
}
  0x43   :  { %67 = dma.hbm_to_vmem [thread:$0]  %s1090_s5, 1024, %s957_s30, [#allocation9], %s871_s13, %s871_s13, %s872_s14  }
  0x44   :  { %861 = dma.done.wait [#allocation3], 128  }
  0x45   :  { %862 = vsyncadd [#allocation3], 4294967168 }
  0x46   :  { %863 = dma.done.wait [#allocation6], 2048  }
  0x47   :  { %864 = vsyncadd [#allocation6], 4294965248 }
  0x48   :  { %865 = dma.done.wait [#allocation9], 1024  }
  0x49   :  { %866 = vsyncadd [#allocation9], 4294966272  ;;  %v875_v0 = vmov 0.0   ;;  %vm876_vm0 = vmmov 0   ;;  %v726_v1 = vld [vmem:[#allocation5] sm:$0xff]   ;;  %v727_v2 = vld [vmem:[#allocation5 + $0x8] sm:$0xff]  }
  0x4a   :  { %615 = vmatprep.subr.bf16.mxu0 %v875_v0  ;;  %631 = vmatprep.mubr.msk.bf16.mxu0 %vm876_vm0, %v875_v0  ;;  %v728_v3 = vld [vmem:[#allocation5 + $0x10] sm:$0xff]   ;;  %v1002_v4 = vld [vmem:[#allocation7] sm:$0xff]   ;;  %v729_v5 = vld [vmem:[#allocation5 + $0x18] sm:$0xff]   ;;  %s877_s28 = smov [#allocation10]  }
  0x4b   :  { %635 = vmatprep.subr.bf16.mxu1 %v875_v0  ;;  %651 = vmatprep.mubr.msk.bf16.mxu1 %vm876_vm0, %v875_v0  ;;  %v1006_v6 = vld [vmem:[#allocation7 + $0x8] sm:$0xff]   ;;  %v730_v7 = vld [vmem:[#allocation5 + $0x20] sm:$0xff]   ;;  %v1011_v8 = vld [vmem:[#allocation7 + $0x10] sm:$0xff]   ;;  %s528_s29 = sshll.u32 %s877_s28, 4  ;;  %s529_s29 = int_to_ptr.vmem [resolvable:$true] %s528_s29 }
  0x4c   :  { %616 = vmatpush3.bf16.msra.mxu0 %v726_v1  ;;  %636 = vmatpush3.bf16.msra.mxu1 %v1002_v4  ;;  %v731_v9 = vld [vmem:[#allocation5 + $0x28] sm:$0xff]   ;;  %v1014_v10 = vld [vmem:[#allocation7 + $0x18] sm:$0xff]   ;;  %v732_v11 = vld [vmem:[#allocation5 + $0x30] sm:$0xff]   ;;  %s839_s30 = scalar_lea.vmem %s529_s29, 256  ;;  %p844_p5 = scmp.lt.s32.totalorder %s529_s29, %s529_s29 }
  0x4d   :  { %617 = vmatprep.subr.bf16.mxu0 %v875_v0  ;;  %637 = vmatprep.subr.bf16.mxu1 %v875_v0  ;;  %v739_v12 = vld [vmem:[#allocation7 + $0x20] sm:$0xff]   ;;  %v733_v13 = vld [vmem:[#allocation5 + $0x38] sm:$0xff]   ;;  %v740_v14 = vld [vmem:[#allocation7 + $0x28] sm:$0xff]   ;;  %p840_p4 = scmp.ne.s32.totalorder %s529_s29, %s839_s30  ;;  %p845_p6 = scmp.lt.s32.totalorder %s839_s30, %s839_s30 }
  0x4e   :  { %v734_v15 = vld [vmem:[#allocation2] sm:$0xff]   ;;  %v741_v16 = vld [vmem:[#allocation7 + $0x30] sm:$0xff]   ;;  %v743_v38 = vld [vmem:[#allocation8] sm:$0xff]  }
  0x4f   :  { %v742_v17 = vld [vmem:[#allocation7 + $0x38] sm:$0xff]   ;;  %v744_v39 = vld [vmem:[#allocation8 + $0x8] sm:$0xff]   ;;  %v745_v40 = vld [vmem:[#allocation8 + $0x10] sm:$0xff]   ;;  %p846_p7 = por %p845_p6, %p844_p5 }
  0x50   :  { %618 = vmatpush3.bf16.msra.mxu0 %v727_v2  ;;  %638 = vmatpush3.bf16.msra.mxu1 %v1006_v6  ;;  %v543_v18 = vld [vmem:[%s1087_s2] ss:$0 sm:$0xff]  ;;  %v747_v42 = vld [vmem:[#allocation8 + $0x20] sm:$0xff]   ;;  %v748_v43 = vld [vmem:[#allocation8 + $0x28] sm:$0xff]  }
  0x51   :  { %619 = vmatprep.subr.bf16.mxu0 %v875_v0  ;;  %639 = vmatprep.subr.bf16.mxu1 %v875_v0  ;;  %v542_v28 = vld [vmem:[%s1089_s4] ss:$0 sm:$0xff]  ;;  %v749_v53 = vld [vmem:[#allocation8 + $0x30] sm:$0xff]   ;;  %p847_p8 = pnand %p846_p7, %p840_p4 }
  0x52   :  { %v746_v41 = vld [vmem:[#allocation8 + $0x18] sm:$0xff]  }
  0x53   :  { %v750_v54 = vld [vmem:[#allocation8 + $0x38] sm:$0xff]  }
  0x54   :  { %620 = vmatpush3.bf16.msra.mxu0 %v728_v3  ;;  %640 = vmatpush3.bf16.msra.mxu1 %v1011_v8  ;;  %v561_v1 = vld [vmem:[%s1091_s6] ss:$0 sm:$0xff] }
  0x55   :  { %621 = vmatprep.subr.bf16.mxu0 %v875_v0  ;;  %641 = vmatprep.subr.bf16.mxu1 %v875_v0 }
  0x58   :  { %622 = vmatpush3.bf16.msra.mxu0 %v729_v5  ;;  %642 = vmatpush3.bf16.msra.mxu1 %v1014_v10 }
  0x59   :  { %623 = vmatprep.subr.bf16.mxu0 %v875_v0  ;;  %643 = vmatprep.subr.bf16.mxu1 %v875_v0 }
  0x5c   :  { %624 = vmatpush3.bf16.msra.mxu0 %v730_v7  ;;  %644 = vmatpush3.bf16.msra.mxu1 %v739_v12 }
  0x5d   :  { %625 = vmatprep.subr.bf16.mxu0 %v875_v0  ;;  %645 = vmatprep.subr.bf16.mxu1 %v875_v0 }
  0x60   :  { %626 = vmatpush3.bf16.msra.mxu0 %v731_v9  ;;  %646 = vmatpush3.bf16.msra.mxu1 %v740_v14 }
  0x61   :  { %627 = vmatprep.subr.bf16.mxu0 %v875_v0  ;;  %647 = vmatprep.subr.bf16.mxu1 %v875_v0 }
  0x64   :  { %628 = vmatpush3.bf16.msra.mxu0 %v732_v11  ;;  %648 = vmatpush3.bf16.msra.mxu1 %v741_v16 }
  0x65   :  { %629 = vmatprep.subr.bf16.mxu0 %v875_v0  ;;  %649 = vmatprep.subr.bf16.mxu1 %v875_v0 }
  0x68   :  { %630 = vmatpush3.bf16.msra.mxu0 %v733_v13  ;;  %650 = vmatpush3.bf16.msra.mxu1 %v742_v17 }
  0x69   :  { %655 = vmatprep.subr.bf16.mxu0 %v875_v0  ;;  %675 = vmatprep.subr.bf16.mxu1 %v875_v0 }
  0x6b   :  { %632 = vmatmul.mubr.bf16.vlgmr.msra.gmra.mrb[0].mxu0 %v734_v15 }
  0x6c   :  { %656 = vmatpush3.bf16.msra.mxu0 %v1002_v4  ;;  %671 = vmatprep.mubr.msk.bf16.mxu0 %vm876_vm0, %v875_v0 }
  0x6d   :  { %657 = vmatprep.subr.bf16.mxu0 %v875_v0 }
  0x70   :  { %658 = vmatpush3.bf16.msra.mxu0 %v1006_v6 }
  0x71   :  { %659 = vmatprep.subr.bf16.mxu0 %v875_v0 }
  0x74   :  { %660 = vmatpush3.bf16.msra.mxu0 %v1011_v8 }
  0x75   :  { %661 = vmatprep.subr.bf16.mxu0 %v875_v0 }
  0x78   :  { %662 = vmatpush3.bf16.msra.mxu0 %v1014_v10 }
  0x79   :  { %663 = vmatprep.subr.bf16.mxu0 %v875_v0 }
  0x7c   :  { %664 = vmatpush3.bf16.msra.mxu0 %v739_v12 }
  0x7d   :  { %665 = vmatprep.subr.bf16.mxu0 %v875_v0 }
  0x80   :  { %666 = vmatpush3.bf16.msra.mxu0 %v740_v14 }
  0x81   :  { %667 = vmatprep.subr.bf16.mxu0 %v875_v0 }
  0x84   :  { %668 = vmatpush3.bf16.msra.mxu0 %v741_v16 }
  0x85   :  { %669 = vmatprep.subr.bf16.mxu0 %v875_v0 }
  0x88   :  { %670 = vmatpush3.bf16.msra.mxu0 %v742_v17 }
  0x89   :  { %695 = vmatprep.subr.bf16.mxu0 %v875_v0 }
 0x13e   :  { %v236_v19 = vpop.f32.mrb[0].mxu0 }
 0x13f   :  { %v237_v20 = vadd.f32 %v543_v18, %v236_v19  ;;  %v633_v21 = vpop.f32.mrb[1].mxu0 }
 0x140   :  { %v239_v22 = vpop.f32.mrb[2].mxu0 }
 0x141   :  { %v240_v23 = vadd.f32 %v543_v18, %v239_v22  ;;  %v634_v24 = vpop.f32.mrb[3].mxu0  ;;  %v243_v25 = vmax.f32 %v237_v20, 0.0 }
 0x143   :  { %v244_v26 = vmax.f32 %v240_v23, 0.0 }
 0x145   :  { %v245_v27 = vpack.c.bf16 %v244_v26, %v243_v25 }
 0x147   :  { %652 = vmatmul.mubr.bf16.vlgmr.msra.gmra.mrb[0].mxu1 %v245_v27 }
 0x148   :  { %676 = vmatpush3.bf16.msra.mxu1 %v1002_v4  ;;  %691 = vmatprep.mubr.msk.bf16.mxu1 %vm876_vm0, %v875_v0 }
 0x149   :  { %677 = vmatprep.subr.bf16.mxu1 %v875_v0 }
 0x14c   :  { %678 = vmatpush3.bf16.msra.mxu1 %v1006_v6 }
 0x14d   :  { %679 = vmatprep.subr.bf16.mxu1 %v875_v0 }
 0x150   :  { %680 = vmatpush3.bf16.msra.mxu1 %v1011_v8 }
 0x151   :  { %681 = vmatprep.subr.bf16.mxu1 %v875_v0 }
 0x154   :  { %682 = vmatpush3.bf16.msra.mxu1 %v1014_v10 }
 0x155   :  { %683 = vmatprep.subr.bf16.mxu1 %v875_v0 }
 0x158   :  { %684 = vmatpush3.bf16.msra.mxu1 %v739_v12 }
 0x159   :  { %685 = vmatprep.subr.bf16.mxu1 %v875_v0 }
 0x15c   :  { %686 = vmatpush3.bf16.msra.mxu1 %v740_v14 }
 0x15d   :  { %687 = vmatprep.subr.bf16.mxu1 %v875_v0 }
 0x160   :  { %688 = vmatpush3.bf16.msra.mxu1 %v741_v16 }
 0x161   :  { %689 = vmatprep.subr.bf16.mxu1 %v875_v0 }
 0x164   :  { %690 = vmatpush3.bf16.msra.mxu1 %v742_v17 }
 0x21a   :  { %v328_v29 = vpop.f32.mrb[0].mxu1 }
 0x21b   :  { %v329_v30 = vadd.f32 %v542_v28, %v328_v29  ;;  %v653_v31 = vpop.f32.mrb[1].mxu1 }
 0x21c   :  { %v331_v32 = vpop.f32.mrb[2].mxu1 }
 0x21d   :  { %v332_v33 = vadd.f32 %v542_v28, %v331_v32  ;;  %v654_v34 = vpop.f32.mrb[3].mxu1  ;;  %v335_v35 = vmax.f32 %v329_v30, 0.0 }
 0x21f   :  { %v336_v36 = vmax.f32 %v332_v33, 0.0 }
 0x221   :  { %v337_v37 = vpack.c.bf16 %v336_v36, %v335_v35 }
 0x223   :  { %672 = vmatmul.mubr.bf16.vlgmr.msra.gmra.mrb[4].mxu0 %v337_v37 }
 0x224   :  { %711 = vmatprep.mubr.msk.bf16.mxu0 %vm876_vm0, %v875_v0  ;;  %696 = vmatpush3.bf16.msra.mxu0 %v743_v38 }
 0x225   :  { %697 = vmatprep.subr.bf16.mxu0 %v875_v0 }
 0x228   :  { %698 = vmatpush3.bf16.msra.mxu0 %v744_v39 }
 0x229   :  { %699 = vmatprep.subr.bf16.mxu0 %v875_v0 }
 0x22c   :  { %700 = vmatpush3.bf16.msra.mxu0 %v745_v40 }
 0x22d   :  { %701 = vmatprep.subr.bf16.mxu0 %v875_v0 }
 0x230   :  { %702 = vmatpush3.bf16.msra.mxu0 %v746_v41 }
 0x231   :  { %703 = vmatprep.subr.bf16.mxu0 %v875_v0 }
 0x234   :  { %704 = vmatpush3.bf16.msra.mxu0 %v747_v42 }
 0x235   :  { %705 = vmatprep.subr.bf16.mxu0 %v875_v0 }
 0x238   :  { %706 = vmatpush3.bf16.msra.mxu0 %v748_v43 }
 0x239   :  { %707 = vmatprep.subr.bf16.mxu0 %v875_v0 }
 0x23c   :  { %708 = vmatpush3.bf16.msra.mxu0 %v749_v53 }
 0x23d   :  { %709 = vmatprep.subr.bf16.mxu0 %v875_v0 }
 0x240   :  { %710 = vmatpush3.bf16.msra.mxu0 %v750_v54 }
 0x2f6   :  { %v372_v44 = vpop.f32.mrb[4].mxu0 }
 0x2f7   :  { %v373_v45 = vadd.f32 %v542_v28, %v372_v44  ;;  %v673_v46 = vpop.f32.mrb[5].mxu0 }
 0x2f8   :  { %v375_v47 = vpop.f32.mrb[6].mxu0 }
 0x2f9   :  { %v376_v48 = vadd.f32 %v542_v28, %v375_v47  ;;  %v674_v49 = vpop.f32.mrb[7].mxu0  ;;  %v379_v50 = vmax.f32 %v373_v45, 0.0 }
 0x2fb   :  { %v380_v51 = vmax.f32 %v376_v48, 0.0 }
 0x2fd   :  { %v381_v52 = vpack.c.bf16 %v380_v51, %v379_v50 }
 0x2ff   :  { %692 = vmatmul.mubr.bf16.vlgmr.msra.gmra.mrb[4].mxu1 %v381_v52 }
 0x3d2   :  { %v416_v55 = vpop.f32.mrb[4].mxu1 }
 0x3d3   :  { %v417_v56 = vadd.f32 %v542_v28, %v416_v55  ;;  %v693_v57 = vpop.f32.mrb[5].mxu1 }
 0x3d4   :  { %v419_v58 = vpop.f32.mrb[6].mxu1 }
 0x3d5   :  { %v420_v59 = vadd.f32 %v542_v28, %v419_v58  ;;  %v694_v60 = vpop.f32.mrb[7].mxu1  ;;  %v423_v61 = vmax.f32 %v417_v56, 0.0 }
 0x3d7   :  { %v424_v62 = vmax.f32 %v420_v59, 0.0 }
 0x3d9   :  { %v425_v63 = vpack.c.bf16 %v424_v62, %v423_v61 }
 0x3db   :  { %712 = vmatmul.mubr.bf16.vlgmr.msra.gmra.mrb[8].mxu0 %v425_v63 }
 0x4ae   :  { %v514_v2 = vpop.f32.mrb[8].mxu0 }
 0x4af   :  { %v515_v0 = vadd.f32 %v561_v1, %v514_v2  ;;  %v713_v3 = vpop.f32.mrb[9].mxu0 }
 0x4b0   :  { %v517_v4 = vpop.f32.mrb[10].mxu0 }
 0x4b1   :  { %521 = vst [vmem:[#allocation10] sm:$0xff] %v515_v0  ;;  %v518_v5 = vadd.f32 %v561_v1, %v517_v4  ;;  %v714_v6 = vpop.f32.mrb[11].mxu0 }
 0x4b3   :  { %522 = vst [vmem:[#allocation10 + $0x8] sm:$0xff] %v518_v5 }
 0x4b4   :  { %850 = shalt.err (!%p847_p8)
}
 0x4b5   :  { %s851_s9 = scalar_lea.hbm %s1092_s7, 256 }
 0x4b6   :  { %p852_p9 = scmp.ne.s32.totalorder %s1092_s7, %s851_s9  ;;  %p855_p10 = scmp.lt.u32.totalorder %s851_s9, %s1092_s7 }
 0x4b8   :  { %p857_p11 = pnand %p855_p10, %p852_p9 }
 0x4ba   :  { %860 = shalt.err (!%p857_p11)
}
 0x4bb   :  { %s878_s16 = smov 128   ;;  %s879_s0 = smov 8  }
 0x4bc   :  { %534 = dma.vmem_to_hbm [thread:$0]  %s529_s29, 256, %s1092_s7, [#allocation4], %s878_s16, %s878_s16, %s879_s0  }
 0x4bd   :  { %867 = dma.done.wait [#allocation4], 256  }
 0x4be   :  { %868 = vsyncadd [#allocation4], 4294967040 }
 0x4bf   :  { %538 = vsyncpa [#allocation3], 1 }
 0x4c0   :  { %539 = vsyncpa [#allocation6], 1 }
 0x4c1   :  { %540 = vsyncpa [#allocation9], 1 }
 0x4c2   :  { %541 = vsyncpa [#allocation4], 1 }

</bundles_post_ra>
